<compile_context>
chip_gen: v5e
topology: v5e:2x2
jax: 0.10.0
libtpu: 0.0.40
codegen_flags: <defaults>
</compile_context>

<pallas_src>
import jax
import jax.numpy as jnp
from jax.experimental import pallas as pl
from jax.experimental.pallas import tpu as pltpu


def _bool_int_kernel(x_ref, o_ref):
    # Scalar path: aten.Bool(int(a)) == (a != 0), stored as int32 (0 / 1).
    o_ref[0] = (x_ref[0] != 0).astype(jnp.int32)


# Gridless, SMEM-only pallas_call: the minimal-cost kernel shape for this op.
_bool_int_call = pl.pallas_call(
    _bool_int_kernel,
    out_shape=jax.ShapeDtypeStruct((1,), jnp.int32),
    in_specs=[pl.BlockSpec(memory_space=pltpu.MemorySpace.SMEM)],
    out_specs=pl.BlockSpec(memory_space=pltpu.MemorySpace.SMEM),
)


@jax.jit
def _bool_int_device(a: jax.Array) -> jax.Array:
    """Single fused device dispatch: nonzero-reduce + narrow + Pallas kernel."""
    # Nonzero test in the ORIGINAL dtype (safe for any integer width), then
    # narrow the 0/1 indicator to int32 for the SMEM scalar path.
    x = (a != 0).astype(jnp.int32).reshape(1)
    return _bool_int_call(x)


def bool_int_true(a: jax.Array) -> bool:
    """Equivalent of `bool(aten.Bool(int(a)))` for a 0-d integer tensor `a`."""
    assert a.shape == (), a.shape
    assert jnp.issubdtype(a.dtype, jnp.integer), a.dtype

    out = _bool_int_device(a)
    out = jax.block_until_ready(out)

    # Single host pull (the unavoidable D2H sync), then Python bool.
    v = jax.device_get(out)
    return bool(int(v[0]))


if __name__ == "__main__":
    key = jax.random.PRNGKey(0)
    # Deterministic 0-d integer "tensor"; the True-variant of the module uses
    # a nonzero scalar, so draw from [1, 100).
    a = jax.random.randint(key, shape=(), minval=1, maxval=100, dtype=jnp.int32)
    a = jax.block_until_ready(a)

    result = bool_int_true(a)

    # Reference: bool(int(a)) in plain Python terms.
    expected = bool(int(a))
    assert result == expected, (result, expected)
    assert isinstance(result, bool)
    assert result is True

    # Also sanity-check the False path (bool(0) == False) with the same kernel.
    zero = jnp.zeros((), dtype=jnp.int32)
    assert bool_int_true(zero) is False

    print("KERNEL_OK")
</pallas_src>

<mosaic_0001>
module attributes {stable_mosaic.version = 11 : i64} {
  func.func @_bool_int_kernel(%arg0: memref<1xi32, #tpu.memory_space<smem>>, %arg1: memref<1xi32, #tpu.memory_space<smem>>) attributes {dimension_semantics = [], scalar_prefetch = 0 : i64, scratch_operands = 0 : i64, tpu.core_type = #tpu.core_type<tc>} {
    %c0 = arith.constant 0 : index
    %0 = memref.load %arg0[%c0] : memref<1xi32, #tpu.memory_space<smem>>
    %c0_i32 = arith.constant 0 : i32
    %1 = arith.cmpi ne, %0, %c0_i32 : i32
    %2 = arith.extui %1 : i1 to i32
    %c0_0 = arith.constant 0 : index
    %3 = memref.load %arg1[%c0_0] : memref<1xi32, #tpu.memory_space<smem>>
    memref.store %2, %arg1[%c0_0] : memref<1xi32, #tpu.memory_space<smem>>
    return
  }
}

</mosaic_0001>

<bundles_post_ra>
// kernel: _bool_int_device.1
= control target key start
LH: loop header
LB: loop body
LE: loop exit
PB: predicated region body
PF: predicated region fallthrough
CT: control target
= control target key end

     0   :  { %7 = vsyncpa [#allocation4], 0  ;;  %s45_s12 = smov [#allocation3]   ;;  %s62_s0 = inlined_call_operand.<no memory space> [shape: s32[1], index: 0, kind: input, shape index: {}]   ;;  %s63_s1 = inlined_call_operand.hbm [shape: s32[1], index: 1, kind: output, shape index: {}]  }
   0x1   :  { %p11_p0 = scmp.ne.s32.totalorder %s62_s0, 0  ;;  %s20_s10 = sshll.u32 %s63_s1, 4  ;;  %s21_s10 = int_to_ptr.hbm [resolvable:$true] %s20_s10 }
   0x3   :  { %s12_s11 = scalar_select %p11_p0, 1, 0 }
   0x5   :  { %14 = sst [smem:[#allocation3]] %s12_s11 }
   0x6   :  { %23 = dma.smem_to_hbm %s45_s12, 16, %s21_s10, [#allocation4]  }
   0x7   :  { %43 = dma.done.wait [#allocation4], 16  }
   0x8   :  { %44 = vsyncadd [#allocation4], 4294967280 }
   0x9   :  { %28 = sfence }
   0xa   :  { %29 = vsyncpa [#allocation4], 1 }

</bundles_post_ra>
